<compile_context>
chip_gen: v7x
topology: tpu7x:2x2x1
jax: 0.10.0
libtpu: 0.0.40
codegen_flags: <defaults>
</compile_context>

<pallas_src>
import functools

import jax
import jax.numpy as jnp
import numpy as np
from jax.experimental import pallas as pl
from jax.experimental.pallas import tpu as pltpu

_ROW_CHUNK = 32  # row granularity: multiple of the sublane tile for f32/bf16/bool


def _moments_kernel(pred_ref, targ_ref, mask_ref, out_ref, *, ht, chunk, h_total, ragged):
    """One grid step = one (batch, row-tile) slab.

    pred/targ/mask blocks: (1, ht, W), native dtypes.
    out block: (1, 1, 6, W) f32; sublane row k holds the lane partials of moment k
    summed over this tile's valid rows.  Moment order: a00, a01, a11, b0, b1, c.
    """
    W = pred_ref.shape[-1]
    row0 = pl.program_id(1) * ht  # global row offset of this tile

    def slab_moments(local_start, nrows):
        """Six (1, W) partial sums for tile rows [local_start, local_start+nrows)."""
        rs = pl.ds(local_start, nrows)
        # Cast right after load: VPU casts are hidden under HBM slack, and this
        # keeps the whole pipeline in f32 (required on v5e which has no bf16 VPU).
        p = pred_ref[0, rs, :].astype(jnp.float32)
        t = targ_ref[0, rs, :].astype(jnp.float32)
        m = mask_ref[0, rs, :].astype(jnp.float32)
        if ragged:
            # Rows past H in the last (partial) block are unspecified garbage in
            # the VMEM buffer -> zero them (incl. p/t so stray NaN*0 cannot leak).
            rid = row0 + local_start + jax.lax.broadcasted_iota(jnp.int32, (nrows, W), 0)
            inb = rid < h_total
            p = jnp.where(inb, p, 0.0)
            t = jnp.where(inb, t, 0.0)
            m = jnp.where(inb, m, 0.0)
        mp = m * p
        mt = m * t
        s = lambda x: jnp.sum(x, axis=0, keepdims=True)  # sublane-only reduce -> (1, W)
        return (s(mp * p), s(mp), s(m), s(mp * t), s(mt), s(mt * t))

    n_full = ht // chunk
    tail = ht - n_full * chunk

    acc = tuple(jnp.zeros((1, W), jnp.float32) for _ in range(6))

    if n_full == 1:
        acc = tuple(a + d for a, d in zip(acc, slab_moments(0, chunk)))
    elif n_full > 1:
        def body(i, carry):
            start = pl.multiple_of(i * chunk, chunk)
            part = slab_moments(start, chunk)
            return tuple(a + d for a, d in zip(carry, part))
        acc = jax.lax.fori_loop(0, n_full, body, acc)

    if tail:  # static remainder of the tile (ht not a multiple of chunk)
        acc = tuple(a + d for a, d in zip(acc, slab_moments(n_full * chunk, tail)))

    out_ref[...] = jnp.concatenate(acc, axis=0).reshape(1, 1, 6, W)


def _vmem_budgets():
    """(input-tile byte budget, vmem_limit_bytes) derived from the local chip."""
    cap = 64 * 1024 * 1024  # conservative fallback (v7x per-TC physical VMEM)
    try:
        info = pltpu.get_tpu_info()
        cap = int(getattr(info, "vmem_capacity_bytes", cap)) or cap
    except Exception:
        pass
    tile_budget = max(8 << 20, int(cap * 0.45))          # double-buffered input blocks
    vmem_limit = min(int(cap * 0.65), tile_budget + (12 << 20))
    vmem_limit = max(vmem_limit, 32 << 20)
    return tile_budget, vmem_limit


def _choose_row_tile(H, W, bytes_per_elem, budget_bytes):
    """Largest row tile keeping double-buffered input blocks under budget."""
    bytes_per_row = bytes_per_elem * W * 2  # pred + targ + mask, x2 buffers
    max_rows = max(1, budget_bytes // bytes_per_row)
    if H <= max_rows:
        return H                             # whole image in one slab
    ht = (max_rows // _ROW_CHUNK) * _ROW_CHUNK
    return max(ht, _ROW_CHUNK)               # ragged tail handled in-kernel


def scale_and_shift_invariant_loss(prediction, target, mask, *, row_tile=None):
    """prediction/target: (B, H, W) float (any dtype); mask: (B, H, W) bool.

    Returns a scalar f32 equal to ScaleAndShiftInvariantLoss.forward
    (reduction_type='batch').
    """
    B, H, W = prediction.shape
    assert target.shape == (B, H, W) and mask.shape == (B, H, W)

    in_bytes = (jnp.dtype(prediction.dtype).itemsize
                + jnp.dtype(target.dtype).itemsize
                + jnp.dtype(mask.dtype).itemsize)

    tile_budget, vmem_limit = _vmem_budgets()
    ht = row_tile if row_tile is not None else _choose_row_tile(H, W, in_bytes, tile_budget)
    n_h = pl.cdiv(H, ht)
    ragged = (H % ht) != 0
    chunk = min(_ROW_CHUNK, ht)

    kernel = functools.partial(_moments_kernel, ht=ht, chunk=chunk, h_total=H, ragged=ragged)

    map_in = pl.BlockSpec((1, ht, W), lambda b, h: (b, h, 0))

    # (B, n_h, 6, W) lane partials; every grid step owns one block -> both axes parallel.
    moments = pl.pallas_call(
        kernel,
        out_shape=jax.ShapeDtypeStruct((B, n_h, 6, W), jnp.float32),
        grid=(B, n_h),
        in_specs=[map_in, map_in, map_in],
        out_specs=pl.BlockSpec((1, 1, 6, W), lambda b, h: (b, h, 0, 0)),
        compiler_params=pltpu.CompilerParams(
            dimension_semantics=("parallel", "parallel"),
            vmem_limit_bytes=vmem_limit,
        ),
    )(prediction, target, mask)

    # Tiny per-batch epilogue in plain JAX: finish lane/tile sums, 2x2 solve,
    # residual via the normal-equation identity.
    m6 = jnp.sum(moments, axis=(1, 3))  # (B, 6)
    a00, a01, a11, b0, b1, c = (m6[:, k] for k in range(6))

    det = a00 * a11 - a01 * a01
    valid = det != 0.0
    safe_det = jnp.where(valid, det, 1.0)
    scale = jnp.where(valid, (a11 * b0 - a01 * b1) / safe_det, 0.0)
    shift = jnp.where(valid, (-a01 * b0 + a00 * b1) / safe_det, 0.0)

    # sum(m*(scale*p + shift - t)^2) == c - scale*b0 - shift*b1 at the LS optimum
    # (and == c when det == 0, matching the reference's scale=shift=0 branch).
    image_loss = jnp.maximum(c - scale * b0 - shift * b1, 0.0)
    divisor = 2.0 * jnp.sum(a11)
    # TODO(synk): GradientLoss/alpha exist in the PyTorch module but are never
    # added to the returned total in the reference forward(), so they are omitted.
    return jnp.where(divisor == 0.0, 0.0, jnp.sum(image_loss) / divisor)


def _reference_loss(prediction, target, mask):
    """Pure-JAX reference mirroring the PyTorch code exactly (explicit residual pass)."""
    m = mask.astype(jnp.float32)
    p = prediction.astype(jnp.float32)
    t = target.astype(jnp.float32)
    a_00 = jnp.sum(m * p * p, axis=(1, 2))
    a_01 = jnp.sum(m * p, axis=(1, 2))
    a_11 = jnp.sum(m, axis=(1, 2))
    b_0 = jnp.sum(m * p * t, axis=(1, 2))
    b_1 = jnp.sum(m * t, axis=(1, 2))
    det = a_00 * a_11 - a_01 * a_01
    valid = det != 0
    safe = jnp.where(valid, det, 1.0)
    scale = jnp.where(valid, (a_11 * b_0 - a_01 * b_1) / safe, 0.0)
    shift = jnp.where(valid, (-a_01 * b_0 + a_00 * b_1) / safe, 0.0)
    pred_ssi = scale[:, None, None] * p + shift[:, None, None]
    image_loss = jnp.sum((pred_ssi - t) ** 2 * m, axis=(1, 2))
    divisor = jnp.sum(2.0 * a_11)
    return jnp.where(divisor == 0, 0.0, jnp.sum(image_loss) / divisor)


if __name__ == "__main__":
    # Case 1: shapes consistent with Float[Tensor, '1 32 mult'] (batched).
    key = jax.random.PRNGKey(0)
    k1, k2, k3 = jax.random.split(key, 3)
    B, H, W = 2, 32, 256
    prediction = jax.random.uniform(k1, (B, H, W), dtype=jnp.float32)
    target = jax.random.uniform(k2, (B, H, W), dtype=jnp.float32) * 2.0 + 0.5
    mask = jax.random.uniform(k3, (B, H, W)) > 0.3  # bool mask with holes

    loss = jax.block_until_ready(scale_and_shift_invariant_loss(prediction, target, mask))
    ref = jax.block_until_ready(_reference_loss(prediction, target, mask))
    np.testing.assert_allclose(np.asarray(loss), np.asarray(ref), rtol=1e-3, atol=1e-6)

    # Case 2: batch=1, ragged row tiling (H % row_tile != 0) + in-kernel chunk loop.
    k4, k5, k6 = jax.random.split(jax.random.PRNGKey(1), 3)
    B2, H2, W2 = 1, 96, 384
    p2 = jax.random.uniform(k4, (B2, H2, W2), dtype=jnp.float32)
    t2 = jax.random.uniform(k5, (B2, H2, W2), dtype=jnp.float32) + 0.25
    m2 = jax.random.uniform(k6, (B2, H2, W2)) > 0.5
    loss2 = jax.block_until_ready(
        scale_and_shift_invariant_loss(p2, t2, m2, row_tile=64))
    ref2 = jax.block_until_ready(_reference_loss(p2, t2, m2))
    np.testing.assert_allclose(np.asarray(loss2), np.asarray(ref2), rtol=1e-3, atol=1e-6)

    # Case 3: fully masked-out input must return exactly 0.
    m0 = jnp.zeros((1, 32, 128), dtype=jnp.bool_)
    loss0 = jax.block_until_ready(
        scale_and_shift_invariant_loss(p2[:, :32, :128], t2[:, :32, :128], m0))
    np.testing.assert_allclose(np.asarray(loss0), 0.0)

    print("KERNEL_OK")
</pallas_src>

<mosaic_0001>
module attributes {stable_mosaic.version = 11 : i64} {
  func.func @_moments_kernel(%arg0: i32, %arg1: i32, %arg2: memref<1x32x256xf32, #tpu.memory_space<vmem>>, %arg3: memref<1x32x256xf32, #tpu.memory_space<vmem>>, %arg4: memref<1x32x256xi32, #tpu.memory_space<vmem>>, %arg5: memref<1x1x6x256xf32, #tpu.memory_space<vmem>>) attributes {dimension_semantics = [#tpu.dimension_semantics<parallel>, #tpu.dimension_semantics<parallel>], iteration_bounds = array<i64: 2, 1>, scalar_prefetch = 0 : i64, scratch_operands = 0 : i64, tpu.core_type = #tpu.core_type<tc>, window_params = [{transform_indices = @transform_0, window_bounds = array<i64: 1, 32, 256>}, {transform_indices = @transform_1, window_bounds = array<i64: 1, 32, 256>}, {transform_indices = @transform_2, window_bounds = array<i64: 1, 32, 256>}, {transform_indices = @transform_3, window_bounds = array<i64: 1, 1, 6, 256>}]} {
    %cst = arith.constant 0.000000e+00 : f32
    %0 = vector.broadcast %cst : f32 to vector<1x256xf32>
    %cst_0 = arith.constant 0.000000e+00 : f32
    %1 = vector.broadcast %cst_0 : f32 to vector<1x256xf32>
    %cst_1 = arith.constant 0.000000e+00 : f32
    %2 = vector.broadcast %cst_1 : f32 to vector<1x256xf32>
    %cst_2 = arith.constant 0.000000e+00 : f32
    %3 = vector.broadcast %cst_2 : f32 to vector<1x256xf32>
    %cst_3 = arith.constant 0.000000e+00 : f32
    %4 = vector.broadcast %cst_3 : f32 to vector<1x256xf32>
    %cst_4 = arith.constant 0.000000e+00 : f32
    %5 = vector.broadcast %cst_4 : f32 to vector<1x256xf32>
    %c0 = arith.constant 0 : index
    %c0_5 = arith.constant 0 : index
    %c0_6 = arith.constant 0 : index
    %6 = vector.load %arg2[%c0, %c0_5, %c0_6] : memref<1x32x256xf32, #tpu.memory_space<vmem>>, vector<1x32x256xf32>
    %7 = vector.shape_cast %6 : vector<1x32x256xf32> to vector<32x256xf32>
    %c0_7 = arith.constant 0 : index
    %c0_8 = arith.constant 0 : index
    %c0_9 = arith.constant 0 : index
    %8 = vector.load %arg3[%c0_7, %c0_8, %c0_9] : memref<1x32x256xf32, #tpu.memory_space<vmem>>, vector<1x32x256xf32>
    %9 = vector.shape_cast %8 : vector<1x32x256xf32> to vector<32x256xf32>
    %c0_10 = arith.constant 0 : index
    %c0_11 = arith.constant 0 : index
    %c0_12 = arith.constant 0 : index
    %10 = vector.load %arg4[%c0_10, %c0_11, %c0_12] : memref<1x32x256xi32, #tpu.memory_space<vmem>>, vector<1x32x256xi32>
    %11 = vector.shape_cast %10 : vector<1x32x256xi32> to vector<32x256xi32>
    %cst_13 = arith.constant dense<0> : vector<32x256xi32>
    %12 = arith.cmpi ne, %11, %cst_13 : vector<32x256xi32>
    %13 = arith.extui %12 : vector<32x256xi1> to vector<32x256xi32>
    %14 = arith.sitofp %13 : vector<32x256xi32> to vector<32x256xf32>
    %15 = arith.mulf %14, %7 : vector<32x256xf32>
    %16 = arith.mulf %14, %9 : vector<32x256xf32>
    %17 = arith.mulf %15, %7 : vector<32x256xf32>
    %cst_14 = arith.constant dense<0.000000e+00> : vector<256xf32>
    %18 = vector.multi_reduction <add>, %17, %cst_14 [0] : vector<32x256xf32> to vector<256xf32>
    %19 = vector.shape_cast %18 : vector<256xf32> to vector<1x256xf32>
    %cst_15 = arith.constant dense<0.000000e+00> : vector<256xf32>
    %20 = vector.multi_reduction <add>, %15, %cst_15 [0] : vector<32x256xf32> to vector<256xf32>
    %21 = vector.shape_cast %20 : vector<256xf32> to vector<1x256xf32>
    %cst_16 = arith.constant dense<0.000000e+00> : vector<256xf32>
    %22 = vector.multi_reduction <add>, %14, %cst_16 [0] : vector<32x256xf32> to vector<256xf32>
    %23 = vector.shape_cast %22 : vector<256xf32> to vector<1x256xf32>
    %24 = arith.mulf %15, %9 : vector<32x256xf32>
    %cst_17 = arith.constant dense<0.000000e+00> : vector<256xf32>
    %25 = vector.multi_reduction <add>, %24, %cst_17 [0] : vector<32x256xf32> to vector<256xf32>
    %26 = vector.shape_cast %25 : vector<256xf32> to vector<1x256xf32>
    %cst_18 = arith.constant dense<0.000000e+00> : vector<256xf32>
    %27 = vector.multi_reduction <add>, %16, %cst_18 [0] : vector<32x256xf32> to vector<256xf32>
    %28 = vector.shape_cast %27 : vector<256xf32> to vector<1x256xf32>
    %29 = arith.mulf %16, %9 : vector<32x256xf32>
    %cst_19 = arith.constant dense<0.000000e+00> : vector<256xf32>
    %30 = vector.multi_reduction <add>, %29, %cst_19 [0] : vector<32x256xf32> to vector<256xf32>
    %31 = vector.shape_cast %30 : vector<256xf32> to vector<1x256xf32>
    %32 = arith.addf %0, %19 : vector<1x256xf32>
    %33 = arith.addf %1, %21 : vector<1x256xf32>
    %34 = arith.addf %2, %23 : vector<1x256xf32>
    %35 = arith.addf %3, %26 : vector<1x256xf32>
    %36 = arith.addf %4, %28 : vector<1x256xf32>
    %37 = arith.addf %5, %31 : vector<1x256xf32>
    %38 = tpu.concatenate %32, %33, %34, %35, %36, %37 in 0 : vector<1x256xf32>, vector<1x256xf32>, vector<1x256xf32>, vector<1x256xf32>, vector<1x256xf32>, vector<1x256xf32> -> vector<6x256xf32>
    %39 = vector.shape_cast %38 : vector<6x256xf32> to vector<1x1x6x256xf32>
    %c0_20 = arith.constant 0 : index
    %c0_21 = arith.constant 0 : index
    %c0_22 = arith.constant 0 : index
    %c0_23 = arith.constant 0 : index
    %40 = vector.load %arg5[%c0_20, %c0_21, %c0_22, %c0_23] : memref<1x1x6x256xf32, #tpu.memory_space<vmem>>, vector<1x1x6x256xf32>
    tpu.vector_store %arg5[%c0_20, %c0_21, %c0_22, %c0_23], %39 {strides = array<i32>} : memref<1x1x6x256xf32, #tpu.memory_space<vmem>>, vector<1x1x6x256xf32>,
    return
  }
  func.func @transform_0(%arg0: i32, %arg1: i32) -> (i32, i32, i32) {
    %c0_i32 = arith.constant 0 : i32
    %c0_i32_0 = arith.constant 0 : i32
    return %arg0, %arg1, %c0_i32 : i32, i32, i32
  }
  func.func @transform_1(%arg0: i32, %arg1: i32) -> (i32, i32, i32) {
    %c0_i32 = arith.constant 0 : i32
    %c0_i32_0 = arith.constant 0 : i32
    return %arg0, %arg1, %c0_i32 : i32, i32, i32
  }
  func.func @transform_2(%arg0: i32, %arg1: i32) -> (i32, i32, i32) {
    %c0_i32 = arith.constant 0 : i32
    %c0_i32_0 = arith.constant 0 : i32
    return %arg0, %arg1, %c0_i32 : i32, i32, i32
  }
  func.func @transform_3(%arg0: i32, %arg1: i32) -> (i32, i32, i32, i32) {
    %c0_i32 = arith.constant 0 : i32
    %c0_i32_0 = arith.constant 0 : i32
    %c0_i32_1 = arith.constant 0 : i32
    return %arg0, %arg1, %c0_i32, %c0_i32_0 : i32, i32, i32, i32
  }
}

</mosaic_0001>

<bundles_post_ra>
// kernel: tpu_custom_call.1
= control target key start
LH: loop header
LB: loop body
LE: loop exit
PB: predicated region body
PF: predicated region fallthrough
CT: control target
= control target key end

     0   :  { %8 = vsyncpa [#allocation3], 0  ;;  %s1084_s0 = inlined_call_operand.vmem [shape: f32[2,32,256], index: 0, kind: input, shape index: {}]   ;;  %s1085_s1 = inlined_call_operand.hbm [shape: f32[2,32,256], index: 1, kind: input, shape index: {}]   ;;  %s1086_s2 = inlined_call_operand.vmem [shape: s32[2,32,256], index: 2, kind: input, shape index: {}]   ;;  %s1087_s3 = inlined_call_operand.vmem [shape: f32[2,1,6,256], index: 3, kind: output, shape index: {}]  }
   0x1   :  { %10 = vsyncpa [#allocation3 + $0x1], 0  ;;  %s855_s12 = smov 0   ;;  %s857_s13 = smov 0  }
   0x2   :  { %s859_s14 = smov 0   ;;  %s861_s15 = smov 0  }
   0x3   :  { %s863_s16 = smov 0   ;;  %s865_s17 = smov 0  }
   0x4 LB: > { %s662_s18 = sadd.s32 4294967295, %s829_s17   ;;  %s28_s19 = sadd.s32 1, %s825_s16  ;;  %s829_s17 = sphi %s865_s17, %s16_s17   ;;  %s825_s16 = sphi %s863_s16, %s1095_s16   ;;  %s821_s15 = sphi %s861_s15, %s1094_s15   ;;  %s817_s14 = sphi %s859_s14, %s1093_s14   ;;  %s813_s13 = sphi %s857_s13, %s1092_s13   ;;  %s809_s12 = sphi %s855_s12, %s1091_s12  }
   0x5   : > { %p30_p0 = scmp.ge.s32.totalorder %s28_s19, 2  ;;  %s65_s20 = sadd.s32 1, %s817_s14 }
   0x6   : > { %p72_p1 = scmp.ne.s32.totalorder %s817_s14, %s813_s13  ;;  %p73_p2 = scmp.eq.s32.totalorder %s829_s17, 0 }
   0x7   : > { %s1097_s19 = smov (%p30_p0, %s28_s19), 0  ;;  %p78_p4 = scmp.ne.s32.totalorder %s813_s13, %s809_s12 }
   0x8   : > { %p891_p3 = por %p73_p2, %p72_p1  ;;  %s60_s22 = ssub.s32 %s825_s16, %s1097_s19 }
   0x9   : > { %p79_p5 = scmp.eq.s32.totalorder %s662_s18, 0  ;;  %p63_p6 = scmp.eq.s32.totalorder %s60_s22, 0 }
   0xa   : > { %p697_p8 = scmp.lt.s32.totalorder %s829_s17, 2  ;;  %s172_s25 = sand.u32 1, %s817_s14  }
   0xb   : > { %p898_p7 = por %p79_p5, %p78_p4  ;;  %s687_s26 = sshll.u32 %s825_s16, 10 }
   0xc   : > { %s904_s24 = scalar_select %p63_p6, %s817_s14, %s65_s20  }
   0xd   : > { %s666_s27 = sshll.u32 %s172_s25, 6  ;;  %s911_s30 = scalar_lea.hbm %s1085_s1, %s687_s26 }
   0xe   : > { %s176_s4 = scalar_lea.vmem [#allocation2], %s666_s27  ;;  %p915_p9 = pnand %p697_p8, %p891_p3 }
   0xf   : > { %s186_s5 = sshll.u32 %s176_s4, 4  ;;  %s921_s7 = scalar_lea.sflag [#allocation3], %s172_s25  ;;  %s919_s5 = int_to_ptr.vmem [resolvable:$true] %s186_s5 }
  0x10   : > { %s749_s8 = scalar_lea.hbm %s911_s30, 1024  ;;  %p751_p11 = pneg %p915_p9 }
  0x11   : > { %p750_p10 = scmp.ne.s32.totalorder %s911_s30, %s749_s8  ;;  %s754_s11 = scalar_lea.hbm %s1085_s1, 2048 }
  0x12   : > { %p755_p0 = scmp.lt.u32.totalorder %s911_s30, %s1085_s1  ;;  %p756_p1 = scmp.lt.u32.totalorder %s754_s11, %s749_s8 }
  0x13   : > { %p752_p12 = pnand %p751_p11, %p750_p10  ;;  %p758_p3 = scmp.lt.u32.totalorder %s749_s8, %s911_s30 }
  0x14   : > { %p757_p2 = por %p756_p1, %p755_p0 }
  0x15   : > { %p753_p13 = pneg %p752_p12 }
  0x16   : > { %p759_p4 = por %p758_p3, %p757_p2 }
  0x18   : > { %p760_p5 = pnand %p759_p4, %p753_p13 }
  0x1a   : > { %763 = shalt.err (!%p760_p5)
}
  0x1b   : > { %s764_s20 = scalar_lea.vmem %s919_s5, 1024  ;;  %s831_s21 = smov [#allocation2]  }
  0x1c   : > { %p765_p6 = scmp.ne.s32.totalorder %s919_s5, %s764_s20  ;;  %s769_s22 = sshll.u32 %s831_s21, 4  ;;  %s770_s22 = int_to_ptr.vmem [resolvable:$false] %s769_s22 }
  0x1d   : > { %s771_s25 = scalar_lea.vmem %s770_s22, 2048  ;;  %p772_p12 = scmp.lt.s32.totalorder %s919_s5, %s770_s22 }
  0x1e   : > { %p767_p8 = pnand %p765_p6, %p751_p11  ;;  %p773_p0 = scmp.lt.s32.totalorder %s771_s25, %s764_s20 }
  0x20   : > { %p768_p10 = pneg %p767_p8  ;;  %p774_p1 = por %p773_p0, %p772_p12 }
  0x22   : > { %p775_p2 = pnand %p774_p1, %p768_p10 }
  0x24   : > { %778 = shalt.err (!%p775_p2)
}
  0x25   : > { %s832_s26 = smov 256   ;;  %s833_s27 = smov 16  }
  0x26   : > { %696 = dma.hbm_to_vmem [thread:$0]  (!%p915_p9), %s911_s30, 1024, %s919_s5, %s921_s7, %s832_s26, %s832_s26, %s833_s27  }
  0x27   : > { %p669_p11 = scmp.ge.s32.totalorder %s829_s17, 1  ;;  %p208_p13 = scmp.lt.s32.totalorder %s829_s17, 3 }
  0x29   : > { %p209_p3 = pnand %p669_p11, %p208_p13 }
  0x2a   : > { %s214_s28 = sand.u32 (!%p209_p3), 1, %s813_s13  }
  0x2b   : > { %212 = sbr.rel (%p209_p3) target bundleno = 109 (0x6d), region = 32  ;;  %s670_s29 = sshll.u32 (!%p209_p3), %s214_s28, 6 }
  0x2c   : > { %s215_s4 = scalar_lea.sflag (!%p209_p3), [#allocation3], %s214_s28  ;;  %s952_s8 = scalar_lea.vmem (!%p209_p3), [#allocation2], %s670_s29 }
  0x32   : > { %804 = dma.done.wait (%p898_p7), %s215_s4, 1024  }
  0x33   : > { %806 = vsyncadd (%p898_p7), %s215_s4, 4294966272  ;;  %p266_p4 = scmp.lt.s32.totalorder %s821_s15, 1  ;;  %v834_v14 = vmov 0.0   ;;  %v983_v26 = vld [vmem:[%s952_s8] sm:$0xff]  ;;  %v986_v27 = vld [vmem:[%s952_s8 + $0x8] sm:$0xff]  ;;  %vm505_vm8 = vcmask 1040384  }
  0x34   : > { %v1001_v46 = vld [vmem:[%s952_s8 + $0x10] sm:$0xff]  ;;  %v1004_v47 = vld [vmem:[%s952_s8 + $0x18] sm:$0xff]  ;;  %v1011_v56 = vld [vmem:[%s952_s8 + $0x20] sm:$0xff]  ;;  %vm508_vm9 = vcmask 1041408   ;;  %vm511_vm10 = vcmask 1042432   ;;  %vm514_vm11 = vcmask 1043456  }
  0x35   : > { %s1099_s15 = smov (!%p266_p4, %s821_s15), 1  ;;  %v1014_v57 = vld [vmem:[%s952_s8 + $0x28] sm:$0xff]  ;;  %vm517_vm12 = vcmask 1044480  }
  0x36   : > { %s688_s30 = sshll.u32 %s1099_s15, 6  ;;  %s690_s23 = sshll.u32 %s1099_s15, 4 }
  0x37   : > { %s274_s7 = scalar_lea.vmem %s1084_s0, %s688_s30  ;;  %s286_s11 = scalar_lea.vmem %s1086_s2, %s688_s30 }
  0x38   : > { %v297_v0 = vld [vmem:[%s274_s7] sm:$0xff]  ;;  %v314_v2 = vld [vmem:[%s286_s11 + $0x8] sm:$0xff]  ;;  %v299_v4 = vld [vmem:[%s274_s7 + $0x10] sm:$0xff]  ;;  %s296_s20 = scalar_lea.vmem %s1087_s3, %s690_s23 }
  0x39   : > { %v313_v1 = vld [vmem:[%s286_s11] sm:$0xff]  ;;  %v298_v3 = vld [vmem:[%s274_s7 + $0x8] sm:$0xff]  ;;  %v300_v5 = vld [vmem:[%s274_s7 + $0x18] sm:$0xff]  ;;  %vm322_vm1 = vcmp.ne.s32.totalorder %v314_v2, 0 }
  0x3a   : > { %v315_v6 = vld [vmem:[%s286_s11 + $0x10] sm:$0xff]  ;;  %v316_v7 = vld [vmem:[%s286_s11 + $0x18] sm:$0xff]  ;;  %v317_v8 = vld [vmem:[%s286_s11 + $0x20] sm:$0xff]  ;;  %vm321_vm0 = vcmp.ne.s32.totalorder %v313_v1, 0  ;;  %v678_v18 = vsel %vm322_vm1, 1.0, %v834_v14 }
  0x3b   : > { %v318_v9 = vld [vmem:[%s286_s11 + $0x28] sm:$0xff]  ;;  %v319_v10 = vld [vmem:[%s286_s11 + $0x30] sm:$0xff]  ;;  %v320_v11 = vld [vmem:[%s286_s11 + $0x38] sm:$0xff]  ;;  %vm323_vm2 = vcmp.ne.s32.totalorder %v315_v6, 0  ;;  %vm324_vm3 = vcmp.ne.s32.totalorder %v316_v7, 0  ;;  %vm325_vm4 = vcmp.ne.s32.totalorder %v317_v8, 0  ;;  %v346_v28 = vmul.f32 %v678_v18, %v298_v3 }
  0x3c   : > { %v301_v12 = vld [vmem:[%s274_s7 + $0x20] sm:$0xff]  ;;  %v302_v13 = vld [vmem:[%s274_s7 + $0x28] sm:$0xff]  ;;  %vm326_vm5 = vcmp.ne.s32.totalorder %v318_v9, 0  ;;  %vm327_vm6 = vcmp.ne.s32.totalorder %v319_v10, 0  ;;  %vm328_vm7 = vcmp.ne.s32.totalorder %v320_v11, 0  ;;  %v677_v15 = vsel %vm321_vm0, 1.0, %v834_v14 }
  0x3d   : > { %v303_v16 = vld [vmem:[%s274_s7 + $0x30] sm:$0xff]  ;;  %v304_v17 = vld [vmem:[%s274_s7 + $0x38] sm:$0xff]  ;;  %v970_v19 = vsel %vm323_vm2, 1.0, %v834_v14  ;;  %v972_v20 = vsel %vm324_vm3, 1.0, %v834_v14  ;;  %v974_v21 = vsel %vm325_vm4, 1.0, %v834_v14  ;;  %v976_v22 = vsel %vm326_vm5, 1.0, %v834_v14 }
  0x3e   : > { %v978_v23 = vsel %vm327_vm6, 1.0, %v834_v14  ;;  %v980_v24 = vsel %vm328_vm7, 1.0, %v834_v14  ;;  %v345_v25 = vmul.f32 %v677_v15, %v297_v0  ;;  %v347_v29 = vmul.f32 %v970_v19, %v299_v4  ;;  %v1021_v2 = vld [vmem:[%s952_s8 + $0x30] sm:$0xff] }
  0x3f   : > { %v348_v30 = vmul.f32 %v972_v20, %v300_v5  ;;  %v349_v31 = vmul.f32 %v974_v21, %v301_v12  ;;  %v350_v32 = vmul.f32 %v976_v22, %v302_v13  ;;  %v351_v33 = vmul.f32 %v978_v23, %v303_v16 }
  0x40   : > { %v352_v34 = vmul.f32 %v980_v24, %v304_v17  ;;  %v995_v35 = vmul.f32 %v677_v15, %v983_v26  ;;  %v998_v36 = vmul.f32 %v678_v18, %v986_v27  ;;  %v361_v37 = vmul.f32 %v345_v25, %v297_v0 }
  0x41   : > { %v362_v38 = vmul.f32 %v346_v28, %v298_v3  ;;  %v363_v39 = vmul.f32 %v347_v29, %v299_v4  ;;  %v364_v40 = vmul.f32 %v348_v30, %v300_v5  ;;  %v365_v41 = vmul.f32 %v349_v31, %v301_v12  ;;  %v1024_v3 = vld [vmem:[%s952_s8 + $0x38] sm:$0xff] }
  0x42   : > { %v366_v42 = vmul.f32 %v350_v32, %v302_v13  ;;  %v367_v43 = vmul.f32 %v351_v33, %v303_v16  ;;  %v368_v44 = vmul.f32 %v352_v34, %v304_v17  ;;  %v387_v45 = vadd.f32 %v347_v29, %v345_v25 }
  0x43   : > { %v369_v48 = vadd.f32 %v363_v39, %v361_v37  ;;  %v378_v49 = vadd.f32 %v364_v40, %v362_v38  ;;  %v396_v50 = vadd.f32 %v348_v30, %v346_v28  ;;  %v405_v51 = vadd.f32 %v970_v19, %v677_v15 }
  0x44   : > { %v388_v52 = vadd.f32 %v387_v45, %v349_v31  ;;  %v414_v53 = vadd.f32 %v972_v20, %v678_v18  ;;  %v423_v54 = vmul.f32 %v345_v25, %v983_v26  ;;  %v424_v55 = vmul.f32 %v346_v28, %v986_v27 }
  0x45   : > { %v370_v58 = vadd.f32 %v369_v48, %v365_v41  ;;  %v379_v59 = vadd.f32 %v378_v49, %v366_v42  ;;  %v397_v60 = vadd.f32 %v396_v50, %v350_v32  ;;  %v406_v61 = vadd.f32 %v974_v21, %v405_v51 }
  0x46   : > { %v389_v62 = vadd.f32 %v388_v52, %v351_v33  ;;  %v415_v63 = vadd.f32 %v976_v22, %v414_v53  ;;  %v425_v0 = vmul.f32 %v347_v29, %v1001_v46  ;;  %v426_v1 = vmul.f32 %v348_v30, %v1004_v47 }
  0x47   : > { %v371_v4 = vadd.f32 %v370_v58, %v367_v43  ;;  %v380_v5 = vadd.f32 %v379_v59, %v368_v44  ;;  %v398_v6 = vadd.f32 %v397_v60, %v352_v34  ;;  %v407_v7 = vadd.f32 %v978_v23, %v406_v61 }
  0x48   : > { %v390_v8 = vrot.slane %v389_v62, 4  ;;  %v416_v9 = vadd.f32 %v980_v24, %v415_v63  ;;  %v427_v10 = vmul.f32 %v349_v31, %v1011_v56  ;;  %v428_v11 = vmul.f32 %v350_v32, %v1014_v57 }
  0x49   : > { %v372_v12 = vrot.slane %v371_v4, 4  ;;  %v381_v13 = vrot.slane %v380_v5, 4  ;;  %v399_v14 = vrot.slane %v398_v6, 4  ;;  %v408_v15 = vrot.slane %v407_v7, 4 }
  0x4a   : > { %v391_v16 = vadd.f32 %v390_v8, %v389_v62  ;;  %v417_v17 = vrot.slane %v416_v9, 4  ;;  %v429_v18 = vmul.f32 %v351_v33, %v1021_v2  ;;  %v430_v25 = vmul.f32 %v352_v34, %v1024_v3 }
  0x4b   : > { %v373_v28 = vadd.f32 %v372_v12, %v371_v4  ;;  %v382_v29 = vadd.f32 %v381_v13, %v380_v5  ;;  %v400_v30 = vadd.f32 %v399_v14, %v398_v6  ;;  %v409_v37 = vadd.f32 %v408_v15, %v407_v7 }
  0x4c   : > { %v392_v38 = vrot.slane %v391_v16, 2  ;;  %v418_v39 = vadd.f32 %v417_v17, %v416_v9  ;;  %v431_v40 = vadd.f32 %v425_v0, %v423_v54  ;;  %v440_v31 = vadd.f32 %v426_v1, %v424_v55 }
  0x4d   : > { %v374_v41 = vrot.slane %v373_v28, 2  ;;  %v383_v32 = vrot.slane %v382_v29, 2  ;;  %v401_v42 = vrot.slane %v400_v30, 2  ;;  %v410_v43 = vrot.slane %v409_v37, 2 }
  0x4e   : > { %v393_v44 = vadd.f32 %v392_v38, %v391_v16  ;;  %v419_v45 = vrot.slane %v418_v39, 2  ;;  %v432_v48 = vadd.f32 %v431_v40, %v427_v10  ;;  %v441_v49 = vadd.f32 %v440_v31, %v428_v11 }
  0x4f   : > { %v375_v50 = vadd.f32 %v374_v41, %v373_v28  ;;  %v384_v33 = vadd.f32 %v383_v32, %v382_v29  ;;  %v402_v51 = vadd.f32 %v401_v42, %v400_v30  ;;  %v411_v34 = vadd.f32 %v410_v43, %v409_v37 }
  0x50   : > { %v355_v52 = vmul.f32 %v970_v19, %v1001_v46  ;;  %v394_v53 = vrot.slane %v393_v44, 1  ;;  %v433_v58 = vadd.f32 %v432_v48, %v429_v18  ;;  %v442_v59 = vadd.f32 %v441_v49, %v430_v25 }
  0x51   : > { %v356_v54 = vmul.f32 %v972_v20, %v1004_v47  ;;  %v357_v55 = vmul.f32 %v974_v21, %v1011_v56  ;;  %v358_v60 = vmul.f32 %v976_v22, %v1014_v57  ;;  %v359_v61 = vmul.f32 %v978_v23, %v1021_v2 }
  0x52   : > { %v360_v62 = vmul.f32 %v980_v24, %v1024_v3  ;;  %v420_v19 = vadd.f32 %v419_v45, %v418_v39  ;;  %v434_v63 = vrot.slane %v433_v58, 4  ;;  %v443_v0 = vrot.slane %v442_v59, 4 }
  0x53   : > { %v376_v1 = vrot.slane %v375_v50, 1  ;;  %v385_v4 = vrot.slane %v384_v33, 1  ;;  %v403_v5 = vrot.slane %v402_v51, 1  ;;  %v412_v20 = vrot.slane %v411_v34, 1 }
  0x54   : > { %v395_v6 = vadd.f32 %v394_v53, %v393_v44  ;;  %v435_v7 = vadd.f32 %v434_v63, %v433_v58  ;;  %v444_v21 = vadd.f32 %v443_v0, %v442_v59  ;;  %v449_v8 = vadd.f32 %v355_v52, %v995_v35 }
  0x55   : > { %v458_v22 = vadd.f32 %v356_v54, %v998_v36  ;;  %v467_v23 = vmul.f32 %v995_v35, %v983_v26  ;;  %v468_v24 = vmul.f32 %v998_v36, %v986_v27  ;;  %v469_v9 = vmul.f32 %v355_v52, %v1001_v46 }
  0x56   : > { %v436_v10 = vrot.slane %v435_v7, 2  ;;  %v445_v11 = vrot.slane %v444_v21, 2  ;;  %v450_v12 = vadd.f32 %v449_v8, %v357_v55  ;;  %v470_v13 = vmul.f32 %v356_v54, %v1004_v47 }
  0x57   : > { %v377_v14 = vadd.f32 %v376_v1, %v375_v50  ;;  %v459_v15 = vadd.f32 %v458_v22, %v358_v60  ;;  %v471_v16 = vmul.f32 %v357_v55, %v1011_v56  ;;  %v472_v17 = vmul.f32 %v358_v60, %v1014_v57 }
  0x58   : > { %v437_v18 = vadd.f32 %v436_v10, %v435_v7  ;;  %v446_v25 = vadd.f32 %v445_v11, %v444_v21  ;;  %v451_v28 = vadd.f32 %v450_v12, %v359_v61  ;;  %v473_v26 = vmul.f32 %v359_v61, %v1021_v2 }
  0x59   : > { %v460_v35 = vadd.f32 %v459_v15, %v360_v62  ;;  %v474_v27 = vmul.f32 %v360_v62, %v1024_v3  ;;  %v475_v36 = vadd.f32 %v469_v9, %v467_v23  ;;  %v484_v46 = vadd.f32 %v470_v13, %v468_v24 }
  0x5a   : > { %v386_v29 = vadd.f32 %v385_v4, %v384_v33  ;;  %v421_v30 = vrot.slane %v420_v19, 1  ;;  %v452_v37 = vrot.slane %v451_v28, 4  ;;  %v404_v47 = vadd.f32 %v403_v5, %v402_v51 }
  0x5b   : > { %v461_v38 = vrot.slane %v460_v35, 4  ;;  %v476_v39 = vadd.f32 %v475_v36, %v471_v16  ;;  %v485_v56 = vadd.f32 %v484_v46, %v472_v17  ;;  %v413_v40 = vadd.f32 %v412_v20, %v411_v34 }
  0x5c   : > { %v438_v57 = vrot.slane %v437_v18, 1  ;;  %v453_v31 = vadd.f32 %v452_v37, %v451_v28  ;;  %v506_v41 = vsel %vm505_vm8, %v377_v14, %v395_v6  ;;  %v447_v32 = vrot.slane %v446_v25, 1 }
  0x5d   : > { %v462_v2 = vadd.f32 %v461_v38, %v460_v35  ;;  %v477_v42 = vadd.f32 %v476_v39, %v473_v26  ;;  %v486_v43 = vadd.f32 %v485_v56, %v474_v27  ;;  %v422_v3 = vadd.f32 %v421_v30, %v420_v19 }
  0x5e   : > { %v454_v44 = vrot.slane %v453_v31, 2  ;;  %v507_v50 = vsel %vm505_vm8, %v386_v29, %v404_v47  ;;  %v439_v33 = vadd.f32 %v438_v57, %v437_v18  ;;  %v509_v52 = vsel %vm508_vm9, %v506_v41, %v413_v40 }
  0x5f   : > { %v463_v45 = vrot.slane %v462_v2, 2  ;;  %v478_v48 = vrot.slane %v477_v42, 4  ;;  %v487_v49 = vrot.slane %v486_v43, 4  ;;  %v448_v34 = vadd.f32 %v447_v32, %v446_v25 }
  0x60   : > { %v455_v51 = vadd.f32 %v454_v44, %v453_v31  ;;  %v510_v55 = vsel %vm508_vm9, %v507_v50, %v422_v3  ;;  %v512_v63 = vsel %vm511_vm10, %v509_v52, %v439_v33 }
  0x61   : > { %v464_v53 = vadd.f32 %v463_v45, %v462_v2  ;;  %v479_v58 = vadd.f32 %v478_v48, %v477_v42  ;;  %v488_v59 = vadd.f32 %v487_v49, %v486_v43  ;;  %v513_v5 = vsel %vm511_vm10, %v510_v55, %v448_v34 }
  0x62   : > { %v456_v54 = vrot.slane %v455_v51, 1 }
  0x63   : > { %v465_v60 = vrot.slane %v464_v53, 1  ;;  %v480_v61 = vrot.slane %v479_v58, 2  ;;  %v489_v62 = vrot.slane %v488_v59, 2 }
  0x64   : > { %v457_v19 = vadd.f32 %v456_v54, %v455_v51 }
  0x65   : > { %v466_v0 = vadd.f32 %v465_v60, %v464_v53  ;;  %v481_v1 = vadd.f32 %v480_v61, %v479_v58  ;;  %v490_v4 = vadd.f32 %v489_v62, %v488_v59 }
  0x66   : > { %v515_v7 = vsel %vm514_vm11, %v512_v63, %v457_v19 }
  0x67   : > { %v482_v20 = vrot.slane %v481_v1, 1  ;;  %v491_v6 = vrot.slane %v490_v4, 1  ;;  %v516_v21 = vsel %vm514_vm11, %v513_v5, %v466_v0 }
  0x69   : > { %v483_v8 = vadd.f32 %v482_v20, %v481_v1  ;;  %v492_v22 = vadd.f32 %v491_v6, %v490_v4 }
  0x6b   : > { %v518_v23 = vsel %vm517_vm12, %v515_v7, %v483_v8  ;;  %v519_v24 = vsel %vm517_vm12, %v516_v21, %v492_v22 }
  0x6c   : > { %520 = vst [vmem:[%s296_s20] sm:$0x3f] %v518_v23  ;;  %521 = vst [vmem:[%s296_s20 + $0x8] sm:$0x3f] %v519_v24 }
  0x6d PF: > { %s16_s17 = sadd.s32 1, %s829_s17   ;;  %s1091_s12 = smov %s813_s13 }
  0x6e   : > { %p13_p7 = scmp.ge.s32.totalorder %s16_s17, 4   ;;  %s1092_s13 = smov %s817_s14 }
  0x6f   : > { %s1093_s14 = smov %s904_s24  ;;  %s1094_s15 = smov %s825_s16 }
  0x70   : > { %s1095_s16 = smov %s1097_s19  ;;  %15 = sbr.rel (!%p13_p7) target bundleno = 4 (0x4), region = 78 }
  0x77   :  { %551 = vsyncpa [#allocation3], 1 }
  0x78   :  { %553 = vsyncpa [#allocation3 + $0x1], 1 }

</bundles_post_ra>
